<compile_context>
chip_gen: v5e
topology: v5e:2x2
jax: 0.10.0
libtpu: 0.0.40
codegen_flags: <defaults>
</compile_context>

<pallas_src>
import functools
import math

import jax
import jax.numpy as jnp
from jax.experimental import pallas as pl
from jax.experimental.pallas import tpu as pltpu

_LN2 = math.log(2.0)


def _cdiv(a: int, b: int) -> int:
    return -(-a // b)


def _fused_elem_loss(x1, x2, y, w: float):
    """Per-element loss: stable BCE-with-logits for both views + w * squared diff."""
    x1 = x1.astype(jnp.float32)
    x2 = x2.astype(jnp.float32)
    y = y.astype(jnp.float32)
    bce1 = jnp.maximum(x1, 0.0) - x1 * y + jnp.log1p(jnp.exp(-jnp.abs(x1)))
    bce2 = jnp.maximum(x2, 0.0) - x2 * y + jnp.log1p(jnp.exp(-jnp.abs(x2)))
    d = x1 - x2
    return bce1 + bce2 + w * (d * d)


def _loss_kernel(x1_ref, x2_ref, y_ref, out_ref, acc_ref, *,
                 steps_per_split: int, consistency_weight: float):
    i = pl.program_id(1)

    @pl.when(i == 0)
    def _():
        acc_ref[...] = jnp.zeros_like(acc_ref)

    # Hot loop: fused element-wise loss, then a sublane-direction partial
    # reduce into a single (1, lane) accumulator row (1 VPU add per vreg,
    # no block-sized accumulator loads/stores).
    elem = _fused_elem_loss(x1_ref[...], x2_ref[...], y_ref[...], consistency_weight)
    acc_ref[...] += jnp.sum(elem, axis=0, keepdims=True)

    # Epilogue (once per split): single cross-lane reduce of one vreg row.
    @pl.when(i == steps_per_split - 1)
    def _():
        partial = jnp.sum(acc_ref[...])
        out_ref[...] = jnp.broadcast_to(partial, out_ref.shape).astype(jnp.float32)


def multiview_loss(mask_logits_1, mask_logits_2, gt_masks,
                   consistency_weight: float = 1.0,
                   target_block_elems: int = 1 << 20,
                   num_splits: int = 1):
    assert mask_logits_1.shape == mask_logits_2.shape == gt_masks.shape
    w = float(consistency_weight)
    n = 1
    for d in mask_logits_1.shape:
        n *= int(d)

    # Zero-copy flatten (contiguous inputs -> bitcast reshapes).
    f1 = mask_logits_1.reshape(-1)
    f2 = mask_logits_2.reshape(-1)
    fg = gt_masks.reshape(-1)

    # Pick a lane width (multiple of 128) that divides n so the 2-D reshape is free.
    lane = next((c for c in (512, 256, 128) if n % c == 0), None)
    pad = 0
    if lane is None:
        # TODO(synk): n not a multiple of 128 forces one pad copy of the inputs;
        # padded zeros are removed analytically below (each adds exactly 2*ln2).
        lane = 128
        pad = (-n) % lane
        f1 = jnp.pad(f1, (0, pad))
        f2 = jnp.pad(f2, (0, pad))
        fg = jnp.pad(fg, (0, pad))
    n_pad = n + pad
    rows = n_pad // lane

    x1 = f1.reshape(rows, lane)
    x2 = f2.reshape(rows, lane)
    y = fg.reshape(rows, lane)

    # Block sizing: ~target_block_elems per input block, multiple of 8 rows,
    # rebalanced so the ragged row tail stays a sub-percent of the data.
    target_rows = max(8, (target_block_elems // lane) // 8 * 8)
    if rows < 8:
        block_rows = rows              # full (exempt) second-to-last dim
        steps = 1
    elif rows <= target_rows:
        block_rows = (rows // 8) * 8
        steps = rows // block_rows
    else:
        s0 = _cdiv(rows, target_rows)
        block_rows = max(8, ((rows // s0) // 8) * 8)
        steps = rows // block_rows

    # Optional per-core partial sums (v7x); default 1 on single-TC chips.
    num_splits = max(1, min(int(num_splits), steps))
    while steps % num_splits:
        num_splits -= 1
    steps_per_split = steps // num_splits

    kernel = functools.partial(_loss_kernel,
                               steps_per_split=steps_per_split,
                               consistency_weight=w)

    in_spec = pl.BlockSpec((block_rows, lane),
                           lambda s, i: (s * steps_per_split + i, 0))

    bytes_per_step = block_rows * lane * (x1.dtype.itemsize
                                          + x2.dtype.itemsize
                                          + y.dtype.itemsize)
    vmem_limit = int(min(max(2 * bytes_per_step + (8 << 20), 32 << 20), 48 << 20))

    out = pl.pallas_call(
        kernel,
        out_shape=jax.ShapeDtypeStruct((num_splits, 8, 128), jnp.float32),
        grid_spec=pltpu.PrefetchScalarGridSpec(
            num_scalar_prefetch=0,
            grid=(num_splits, steps_per_split),
            in_specs=[in_spec, in_spec, in_spec],
            out_specs=pl.BlockSpec((1, 8, 128), lambda s, i: (s, 0, 0)),
            scratch_shapes=[pltpu.VMEM((1, lane), jnp.float32)],
        ),
        compiler_params=pltpu.CompilerParams(
            dimension_semantics=("parallel", "arbitrary"),
            vmem_limit_bytes=vmem_limit),
    )(x1, x2, y)

    total = jnp.sum(out[:, 0, 0])                       # one scalar per split

    # Ragged row tail (< ~1% of rows): fused XLA elementwise+reduce, no copy.
    rows_main = steps * block_rows
    if rows_main < rows:
        total = total + jnp.sum(_fused_elem_loss(
            x1[rows_main:], x2[rows_main:], y[rows_main:], w))

    if pad:
        # Each zero-padded element contributes bce(0,0)*2 = 2*ln2 exactly.
        total = total - jnp.float32(pad * 2.0 * _LN2)

    return total / jnp.float32(n)


def _reference(l1, l2, gt, w):
    l1 = l1.astype(jnp.float32)
    l2 = l2.astype(jnp.float32)
    gt = gt.astype(jnp.float32)

    def bce_mean(x, t):
        return jnp.mean(jnp.maximum(x, 0.0) - x * t + jnp.log1p(jnp.exp(-jnp.abs(x))))

    return bce_mean(l1, gt) + bce_mean(l2, gt) + w * jnp.mean((l1 - l2) ** 2)


if __name__ == "__main__":
    key = jax.random.PRNGKey(0)
    k1, k2, k3 = jax.random.split(key, 3)

    # Primary shape (NCHW mask logits).
    B, C, H, W = 2, 4, 16, 16
    mask_logits_1 = jax.random.normal(k1, (B, C, H, W), dtype=jnp.float32)
    mask_logits_2 = jax.random.normal(k2, (B, C, H, W), dtype=jnp.float32)
    gt_masks = (jax.random.uniform(k3, (B, C, H, W)) > 0.5).astype(jnp.float32)

    cw = 1.0
    loss_fn = jax.jit(lambda a, b, c: multiview_loss(a, b, c, consistency_weight=cw))
    out = jax.block_until_ready(loss_fn(mask_logits_1, mask_logits_2, gt_masks))
    ref = _reference(mask_logits_1, mask_logits_2, gt_masks, cw)
    assert jnp.allclose(out, ref, rtol=1e-5, atol=1e-5), (out, ref)

    # Ragged-rows shape: lane=256, 9 rows -> 1 full block in-kernel + 1 tail row in JAX.
    sh2 = (2, 3, 16, 24)
    a1 = jax.random.normal(k1, sh2, dtype=jnp.float32)
    a2 = jax.random.normal(k2, sh2, dtype=jnp.float32)
    ag = (jax.random.uniform(k3, sh2) > 0.5).astype(jnp.float32)
    out2 = jax.block_until_ready(
        jax.jit(lambda a, b, c: multiview_loss(a, b, c, consistency_weight=0.5))(a1, a2, ag))
    ref2 = _reference(a1, a2, ag, 0.5)
    assert jnp.allclose(out2, ref2, rtol=1e-5, atol=1e-5), (out2, ref2)

    # Non-128-aligned shape: exercises the pad fallback + analytic 2*ln2 correction.
    sh3 = (3, 5, 17, 16)
    b1 = jax.random.normal(k1, sh3, dtype=jnp.float32)
    b2 = jax.random.normal(k2, sh3, dtype=jnp.float32)
    bg = (jax.random.uniform(k3, sh3) > 0.5).astype(jnp.float32)
    out3 = jax.block_until_ready(
        jax.jit(lambda a, b, c: multiview_loss(a, b, c, consistency_weight=1.0))(b1, b2, bg))
    ref3 = _reference(b1, b2, bg, 1.0)
    assert jnp.allclose(out3, ref3, rtol=1e-5, atol=1e-5), (out3, ref3)

    print("KERNEL_OK")
</pallas_src>

<mosaic_0001>
module attributes {stable_mosaic.version = 11 : i64} {
  func.func @_loss_kernel(%arg0: i32, %arg1: i32, %arg2: memref<4x512xf32, #tpu.memory_space<vmem>>, %arg3: memref<4x512xf32, #tpu.memory_space<vmem>>, %arg4: memref<4x512xf32, #tpu.memory_space<vmem>>, %arg5: memref<1x8x128xf32, #tpu.memory_space<vmem>>, %arg6: memref<1x512xf32, #tpu.memory_space<vmem>>) attributes {dimension_semantics = [#tpu.dimension_semantics<parallel>, #tpu.dimension_semantics<arbitrary>], iteration_bounds = array<i64: 1, 1>, scalar_prefetch = 0 : i64, scratch_operands = 1 : i64, tpu.core_type = #tpu.core_type<tc>, window_params = [{transform_indices = @transform_0, window_bounds = array<i64: 4, 512>}, {transform_indices = @transform_1, window_bounds = array<i64: 4, 512>}, {transform_indices = @transform_2, window_bounds = array<i64: 4, 512>}, {transform_indices = @transform_3, window_bounds = array<i64: 1, 8, 128>}]} {
    %c0_i32 = arith.constant 0 : i32
    %0 = arith.cmpi eq, %arg1, %c0_i32 : i32
    %1 = arith.extui %0 : i1 to i32
    %c0_i32_0 = arith.constant 0 : i32
    %2 = arith.cmpi ne, %1, %c0_i32_0 : i32
    scf.if %2 {
      %cst_17 = arith.constant 0.000000e+00 : f32
      %40 = vector.broadcast %cst_17 : f32 to vector<1x512xf32>
      %c0_18 = arith.constant 0 : index
      %c0_19 = arith.constant 0 : index
      %41 = vector.load %arg6[%c0_18, %c0_19] : memref<1x512xf32, #tpu.memory_space<vmem>>, vector<1x512xf32>
      tpu.vector_store %arg6[%c0_18, %c0_19], %40 {strides = array<i32>} : memref<1x512xf32, #tpu.memory_space<vmem>>, vector<1x512xf32>,
    } else {
    }
    %c0 = arith.constant 0 : index
    %c0_1 = arith.constant 0 : index
    %3 = vector.load %arg2[%c0, %c0_1] : memref<4x512xf32, #tpu.memory_space<vmem>>, vector<4x512xf32>
    %c0_2 = arith.constant 0 : index
    %c0_3 = arith.constant 0 : index
    %4 = vector.load %arg3[%c0_2, %c0_3] : memref<4x512xf32, #tpu.memory_space<vmem>>, vector<4x512xf32>
    %c0_4 = arith.constant 0 : index
    %c0_5 = arith.constant 0 : index
    %5 = vector.load %arg4[%c0_4, %c0_5] : memref<4x512xf32, #tpu.memory_space<vmem>>, vector<4x512xf32>
    %cst = arith.constant 0.000000e+00 : f32
    %6 = vector.broadcast %cst : f32 to vector<4x512xf32>
    %7 = arith.maximumf %3, %6 : vector<4x512xf32>
    %8 = arith.mulf %3, %5 : vector<4x512xf32>
    %9 = arith.subf %7, %8 : vector<4x512xf32>
    %10 = math.absf %3 : vector<4x512xf32>
    %cst_6 = arith.constant 0.000000e+00 : f32
    %11 = vector.broadcast %cst_6 : f32 to vector<4x512xf32>
    %12 = arith.subf %11, %10 : vector<4x512xf32>
    %13 = math.exp %12 : vector<4x512xf32>
    %14 = math.log1p %13 : vector<4x512xf32>
    %15 = arith.addf %9, %14 : vector<4x512xf32>
    %cst_7 = arith.constant 0.000000e+00 : f32
    %16 = vector.broadcast %cst_7 : f32 to vector<4x512xf32>
    %17 = arith.maximumf %4, %16 : vector<4x512xf32>
    %18 = arith.mulf %4, %5 : vector<4x512xf32>
    %19 = arith.subf %17, %18 : vector<4x512xf32>
    %20 = math.absf %4 : vector<4x512xf32>
    %cst_8 = arith.constant 0.000000e+00 : f32
    %21 = vector.broadcast %cst_8 : f32 to vector<4x512xf32>
    %22 = arith.subf %21, %20 : vector<4x512xf32>
    %23 = math.exp %22 : vector<4x512xf32>
    %24 = math.log1p %23 : vector<4x512xf32>
    %25 = arith.addf %19, %24 : vector<4x512xf32>
    %26 = arith.subf %3, %4 : vector<4x512xf32>
    %27 = arith.addf %15, %25 : vector<4x512xf32>
    %28 = arith.mulf %26, %26 : vector<4x512xf32>
    %cst_9 = arith.constant 1.000000e+00 : f32
    %29 = vector.broadcast %cst_9 : f32 to vector<4x512xf32>
    %30 = arith.mulf %29, %28 : vector<4x512xf32>
    %31 = arith.addf %27, %30 : vector<4x512xf32>
    %c0_10 = arith.constant 0 : index
    %c0_11 = arith.constant 0 : index
    %32 = vector.load %arg6[%c0_10, %c0_11] : memref<1x512xf32, #tpu.memory_space<vmem>>, vector<1x512xf32>
    %cst_12 = arith.constant dense<0.000000e+00> : vector<512xf32>
    %33 = vector.multi_reduction <add>, %31, %cst_12 [0] : vector<4x512xf32> to vector<512xf32>
    %34 = vector.shape_cast %33 : vector<512xf32> to vector<1x512xf32>
    %35 = arith.addf %32, %34 : vector<1x512xf32>
    %c0_13 = arith.constant 0 : index
    %c0_14 = arith.constant 0 : index
    %36 = vector.load %arg6[%c0_13, %c0_14] : memref<1x512xf32, #tpu.memory_space<vmem>>, vector<1x512xf32>
    tpu.vector_store %arg6[%c0_13, %c0_14], %35 {strides = array<i32>} : memref<1x512xf32, #tpu.memory_space<vmem>>, vector<1x512xf32>,
    %c0_i32_15 = arith.constant 0 : i32
    %37 = arith.cmpi eq, %arg1, %c0_i32_15 : i32
    %38 = arith.extui %37 : i1 to i32
    %c0_i32_16 = arith.constant 0 : i32
    %39 = arith.cmpi ne, %38, %c0_i32_16 : i32
    scf.if %39 {
      %c0_17 = arith.constant 0 : index
      %c0_18 = arith.constant 0 : index
      %40 = vector.load %arg6[%c0_17, %c0_18] : memref<1x512xf32, #tpu.memory_space<vmem>>, vector<1x512xf32>
      %41 = vector.shape_cast %40 : vector<1x512xf32> to vector<1x1x512xf32>
      %cst_19 = arith.constant dense<0.000000e+00> : vector<1xf32>
      %42 = vector.multi_reduction <add>, %41, %cst_19 [1, 2] : vector<1x1x512xf32> to vector<1xf32>
      %43 = vector.shape_cast %42 : vector<1xf32> to vector<1x1x1xf32>
      %44 = vector.extract %43[0, 0, 0] : f32 from vector<1x1x1xf32>
      %45 = vector.broadcast %44 : f32 to vector<1x8x128xf32>
      %c0_20 = arith.constant 0 : index
      %c0_21 = arith.constant 0 : index
      %c0_22 = arith.constant 0 : index
      %46 = vector.load %arg5[%c0_20, %c0_21, %c0_22] : memref<1x8x128xf32, #tpu.memory_space<vmem>>, vector<1x8x128xf32>
      tpu.vector_store %arg5[%c0_20, %c0_21, %c0_22], %45 {strides = array<i32>} : memref<1x8x128xf32, #tpu.memory_space<vmem>>, vector<1x8x128xf32>,
    } else {
    }
    return
  }
  func.func @transform_0(%arg0: i32, %arg1: i32) -> (i32, i32) {
    %c1_i32 = arith.constant 1 : i32
    %0 = arith.muli %arg0, %c1_i32 : i32
    %1 = arith.addi %0, %arg1 : i32
    %c0_i32 = arith.constant 0 : i32
    %c0_i32_0 = arith.constant 0 : i32
    return %1, %c0_i32 : i32, i32
  }
  func.func @transform_1(%arg0: i32, %arg1: i32) -> (i32, i32) {
    %c1_i32 = arith.constant 1 : i32
    %0 = arith.muli %arg0, %c1_i32 : i32
    %1 = arith.addi %0, %arg1 : i32
    %c0_i32 = arith.constant 0 : i32
    %c0_i32_0 = arith.constant 0 : i32
    return %1, %c0_i32 : i32, i32
  }
  func.func @transform_2(%arg0: i32, %arg1: i32) -> (i32, i32) {
    %c1_i32 = arith.constant 1 : i32
    %0 = arith.muli %arg0, %c1_i32 : i32
    %1 = arith.addi %0, %arg1 : i32
    %c0_i32 = arith.constant 0 : i32
    %c0_i32_0 = arith.constant 0 : i32
    return %1, %c0_i32 : i32, i32
  }
  func.func @transform_3(%arg0: i32, %arg1: i32) -> (i32, i32, i32) {
    %c0_i32 = arith.constant 0 : i32
    %c0_i32_0 = arith.constant 0 : i32
    %c0_i32_1 = arith.constant 0 : i32
    return %arg0, %c0_i32, %c0_i32_0 : i32, i32, i32
  }
}

</mosaic_0001>

<bundles_post_ra>
// kernel: _lambda_.1
= control target key start
LH: loop header
LB: loop body
LE: loop exit
PB: predicated region body
PF: predicated region fallthrough
CT: control target
= control target key end

     0   :  { %v78_v0 = vlaneseq  ;;  %v300_v6 = vmov 0.0   ;;  %vm179_vm5 = vcmask 1043456   ;;  %vm215_vm6 = vcmask 1040384   ;;  %s391_s0 = inlined_call_operand.vmem [shape: f32[4,512], index: 0, kind: input, shape index: {}]   ;;  %s392_s1 = inlined_call_operand.vmem [shape: f32[4,512], index: 1, kind: input, shape index: {}]   ;;  %s393_s2 = inlined_call_operand.vmem [shape: f32[4,512], index: 2, kind: input, shape index: {}]   ;;  %s394_s3 = inlined_call_operand.vmem [shape: f32[1,8,128], index: 3, kind: output, shape index: {}]  }
   0x1   :  { %v324_v1 = vld [vmem:[%s391_s0] sm:$0xff]  ;;  %v329_v2 = vld [vmem:[%s391_s0 + $0x8] sm:$0xff]  ;;  %vm217_vm7 = vcmask 1042434   ;;  %vm219_vm8 = vcmask 1041408  }
   0x2   :  { %vm331_vm0 = vcmp.lt.s32.totalorder %v78_v0, 512  ;;  %v338_v4 = vld [vmem:[%s392_s1] sm:$0xff]  ;;  %v343_v5 = vld [vmem:[%s392_s1 + $0x8] sm:$0xff]  ;;  %v95_v7 = vand.u32 2147483647, %v324_v1  ;;  %v89_v28 = vmax.f32 %v324_v1, 0.0 }
   0x3   :  { %82 = vst.msk [vmem:[#allocation2] sm:$0xf] %vm331_vm0, %v300_v6  ;;  %v96_v8 = vand.u32 2147483647, %v329_v2  ;;  %v129_v11 = vand.u32 2147483647, %v338_v4  ;;  %v157_v57 = vsub.f32 %v324_v1, %v338_v4 }
   0x4   :  { %v97_v9 = vsub.f32 0.0, %v95_v7  ;;  %v130_v12 = vand.u32 2147483647, %v343_v5  ;;  %v87_v20 = vld [vmem:[%s393_s2] sm:$0xff]  ;;  %v88_v22 = vld [vmem:[%s393_s2 + $0x8] sm:$0xff]  ;;  %v90_v29 = vmax.f32 %v329_v2, 0.0 }
   0x5   :  { %v98_v10 = vsub.f32 0.0, %v96_v8  ;;  %v131_v15 = vsub.f32 0.0, %v129_v11  ;;  %v91_v30 = vmul.f32 %v87_v20, %v324_v1  ;;  %v92_v32 = vmul.f32 %v88_v22, %v329_v2 }
   0x6   :  { %v99_v13 = vmul.f32 1.442695, %v97_v9  ;;  %v132_v16 = vsub.f32 0.0, %v130_v12  ;;  %v123_v40 = vmax.f32 %v338_v4, 0.0  ;;  %v124_v42 = vmax.f32 %v343_v5, 0.0 }
   0x7   :  { %v101_v14 = vmul.f32 1.442695, %v98_v10  ;;  %v133_v17 = vmul.f32 1.442695, %v131_v15  ;;  %v125_v43 = vmul.f32 %v87_v20, %v338_v4  ;;  %v126_v46 = vmul.f32 %v88_v22, %v343_v5 }
   0x8   :  { %284 = vpow2.f32 %v99_v13  ;;  %v135_v18 = vmul.f32 1.442695, %v132_v16  ;;  %v93_v54 = vsub.f32 %v89_v28, %v91_v30  ;;  %v94_v58 = vsub.f32 %v90_v29, %v92_v32 }
   0x9   :  { %286 = vpow2.f32 %v101_v14  ;;  %v127_v60 = vsub.f32 %v123_v40, %v125_v43  ;;  %v128_v0 = vsub.f32 %v124_v42, %v126_v46  ;;  %v158_v1 = vsub.f32 %v329_v2, %v343_v5 }
   0xa   :  { %288 = vpow2.f32 %v133_v17  ;;  %v161_v15 = vmul.f32 %v157_v57, %v157_v57 }
   0xb   :  { %290 = vpow2.f32 %v135_v18  ;;  %v162_v17 = vmul.f32 %v158_v1, %v158_v1 }
   0xe   :  { %v285_v19 = vpop.eup %284 }
   0xf   :  { %v287_v21 = vpop.eup %286  ;;  %v103_v23 = vadd.f32 1.0, %v285_v19  ;;  %v106_v24 = vmul.f32 -0.5, %v285_v19  ;;  %v109_v35 = vand.u32 2147483647, %v285_v19 }
  0x10   :  { %v112_v25 = vadd.f32 1.0, %v287_v21  ;;  %v115_v26 = vmul.f32 -0.5, %v287_v21  ;;  %v289_v27 = vpop.eup %288  ;;  %v118_v39 = vand.u32 2147483647, %v287_v21 }
  0x11   :  { %292 = vlog2.f32 %v103_v23  ;;  %v291_v31 = vpop.eup %290  ;;  %v107_v33 = vadd.f32 1.0, %v106_v24  ;;  %v137_v34 = vadd.f32 1.0, %v289_v27  ;;  %v140_v37 = vmul.f32 -0.5, %v289_v27 }
  0x12   :  { %294 = vlog2.f32 %v112_v25  ;;  %v116_v36 = vadd.f32 1.0, %v115_v26  ;;  %v146_v38 = vadd.f32 1.0, %v291_v31  ;;  %v149_v41 = vmul.f32 -0.5, %v291_v31 }
  0x13   :  { %296 = vlog2.f32 %v137_v34  ;;  %v141_v44 = vadd.f32 1.0, %v140_v37  ;;  %v108_v45 = vmul.f32 %v285_v19, %v107_v33  ;;  %v143_v47 = vand.u32 2147483647, %v289_v27 }
  0x14   :  { %298 = vlog2.f32 %v146_v38  ;;  %v150_v48 = vadd.f32 1.0, %v149_v41  ;;  %vm365_vm1 = vcmp.lt.f32.partialorder %v109_v35, 0.0004427343  ;;  %v117_v51 = vmul.f32 %v287_v21, %v116_v36 }
  0x15   :  { %v152_v52 = vand.u32 2147483647, %v291_v31  ;;  %vm369_vm2 = vcmp.lt.f32.partialorder %v118_v39, 0.0004427343  ;;  %v142_v61 = vmul.f32 %v289_v27, %v141_v44  ;;  %vm144_vm3 = vcmp.lt.f32.partialorder %v143_v47, 0.0004427343 }
  0x16   :  { %v151_v6 = vmul.f32 %v291_v31, %v150_v48 }
  0x17   :  { %v293_v49 = vpop.eup %292  ;;  %vm153_vm4 = vcmp.lt.f32.partialorder %v152_v52, 0.0004427343 }
  0x18   :  { %v295_v53 = vpop.eup %294  ;;  %v105_v55 = vmul.f32 0.6931472, %v293_v49 }
  0x19   :  { %v114_v59 = vmul.f32 0.6931472, %v295_v53  ;;  %v297_v62 = vpop.eup %296 }
  0x1a   :  { %v111_v63 = vsel %vm365_vm1, %v108_v45, %v105_v55  ;;  %v299_v7 = vpop.eup %298  ;;  %v139_v9 = vmul.f32 0.6931472, %v297_v62  ;;  %v165_v55 = vld [vmem:[#allocation2] sm:$0xf] }
  0x1b   :  { %v120_v8 = vsel %vm369_vm2, %v117_v51, %v114_v59  ;;  %v121_v4 = vadd.f32 %v111_v63, %v93_v54  ;;  %v148_v10 = vmul.f32 0.6931472, %v299_v7 }
  0x1c   :  { %v122_v11 = vadd.f32 %v120_v8, %v94_v58  ;;  %v145_v12 = vsel %vm144_vm3, %v142_v61, %v139_v9 }
  0x1d   :  { %v154_v13 = vsel %vm153_vm4, %v151_v6, %v148_v10  ;;  %v155_v14 = vadd.f32 %v145_v12, %v127_v60 }
  0x1e   :  { %v156_v16 = vadd.f32 %v154_v13, %v128_v0 }
  0x1f   :  { %v159_v18 = vadd.f32 %v155_v14, %v121_v4 }
  0x20   :  { %v160_v19 = vadd.f32 %v156_v16, %v122_v11 }
  0x21   :  { %v163_v20 = vadd.f32 %v161_v15, %v159_v18 }
  0x22   :  { %v164_v21 = vadd.f32 %v162_v17, %v160_v19 }
  0x23   :  { %168 = vst [vmem:[#allocation1] ss:$2 sm:$0xff] %v163_v20 }
  0x24   :  { %170 = vst [vmem:[#allocation1 + $0x10] ss:$2 sm:$0xff] %v164_v21 }
  0x2a   :  { %v171_v22 = vld.sshfl [vmem:[#allocation1] sm:$0xff pattern:$0x75316420]  ;;  %v172_v23 = vld.sshfl [vmem:[#allocation1 + $0x8] sm:$0xff pattern:$0x75316420] }
  0x2b   :  { %v173_v24 = vld.sshfl [vmem:[#allocation1 + $0x10] sm:$0xff pattern:$0x75316420]  ;;  %v174_v2 = vld.sshfl [vmem:[#allocation1 + $0x18] sm:$0xff pattern:$0x75316420] }
  0x2c   :  { %v180_v5 = vsel %vm179_vm5, %v171_v22, 0.0  ;;  %v187_v25 = vsel %vm179_vm5, %v172_v23, 0.0  ;;  %v194_v26 = vsel %vm179_vm5, %v173_v24, 0.0  ;;  %v201_v27 = vsel %vm179_vm5, %v174_v2, 0.0 }
  0x2d   :  { %v181_v28 = vrot.slane %v180_v5, 4  ;;  %v188_v29 = vrot.slane %v187_v25, 4  ;;  %v195_v30 = vrot.slane %v194_v26, 4  ;;  %v202_v31 = vrot.slane %v201_v27, 4 }
  0x2f   :  { %v182_v32 = vadd.f32 %v181_v28, %v180_v5  ;;  %v189_v33 = vadd.f32 %v188_v29, %v187_v25  ;;  %v196_v34 = vadd.f32 %v195_v30, %v194_v26  ;;  %v203_v35 = vadd.f32 %v202_v31, %v201_v27 }
  0x31   :  { %v183_v36 = vrot.slane %v182_v32, 2  ;;  %v190_v37 = vrot.slane %v189_v33, 2  ;;  %v197_v38 = vrot.slane %v196_v34, 2  ;;  %v204_v39 = vrot.slane %v203_v35, 2 }
  0x33   :  { %v184_v40 = vadd.f32 %v183_v36, %v182_v32  ;;  %v191_v41 = vadd.f32 %v190_v37, %v189_v33  ;;  %v198_v42 = vadd.f32 %v197_v38, %v196_v34  ;;  %v205_v43 = vadd.f32 %v204_v39, %v203_v35 }
  0x35   :  { %v185_v44 = vrot.slane %v184_v40, 1  ;;  %v192_v45 = vrot.slane %v191_v41, 1  ;;  %v199_v46 = vrot.slane %v198_v42, 1  ;;  %v206_v47 = vrot.slane %v205_v43, 1 }
  0x37   :  { %v186_v48 = vadd.f32 %v185_v44, %v184_v40  ;;  %v193_v49 = vadd.f32 %v192_v45, %v191_v41  ;;  %v200_v50 = vadd.f32 %v199_v46, %v198_v42  ;;  %v207_v51 = vadd.f32 %v206_v47, %v205_v43 }
  0x39   :  { %v212_v52 = vrot.slane %v193_v49, 7  ;;  %v213_v53 = vrot.slane %v200_v50, 6  ;;  %v214_v54 = vrot.slane %v207_v51, 5 }
  0x3b   :  { %v216_v56 = vsel %vm215_vm6, %v186_v48, %v212_v52  ;;  %v218_v57 = vsel %vm217_vm7, %v213_v53, %v214_v54 }
  0x3c   :  { %v220_v58 = vsel %vm219_vm8, %v216_v56, %v218_v57 }
  0x3d   :  { %v222_v59 = vadd.f32 %v220_v58, %v165_v55 }
  0x3f   :  { %227 = vst.msk [vmem:[#allocation2] sm:$0xf] %vm331_vm0, %v222_v59 }
  0x46   :  { %v231_v60 = vld [vmem:[#allocation2] sm:$0xf] }
  0x47   :  { %v233_v61 = vperm.slane %v231_v60, 0  ;;  %v234_v62 = vperm.slane %v231_v60, 1  ;;  %v235_v63 = vperm.slane %v231_v60, 2  ;;  %v236_v0 = vperm.slane %v231_v60, 3 }
  0x49   :  { %v241_v6 = vsel %vm215_vm6, %v233_v61, 0.0  ;;  %v242_v7 = vsel %vm215_vm6, %v234_v62, 0.0  ;;  %v244_v8 = vsel %vm215_vm6, %v235_v63, 0.0  ;;  %v246_v1 = vsel %vm215_vm6, %v236_v0, 0.0 }
  0x4a   :  { %v243_v9 = vadd.f32 %v242_v7, %v241_v6 }
  0x4c   :  { %v245_v4 = vadd.f32 %v244_v8, %v243_v9 }
  0x4e   :  { %v247_v10 = vadd.f32 %v246_v1, %v245_v4 }
  0x50   :  { %248 = vadd.xlane.f32.xlu0 %v247_v10 }
  0xc3   :  { %v249_v11 = vpop.xlane.xlu0 %248 }
  0xc4   :  { %v250_v3 = vrot.slane %v249_v11, 4 }
  0xc6   :  { %v251_v12 = vadd.f32 %v250_v3, %v249_v11 }
  0xc8   :  { %v252_v13 = vrot.slane %v251_v12, 2 }
  0xca   :  { %v253_v14 = vadd.f32 %v252_v13, %v251_v12 }
  0xcc   :  { %v254_v15 = vrot.slane %v253_v14, 1 }
  0xce   :  { %v255_v16 = vadd.f32 %v254_v15, %v253_v14 }
  0xd0   :  { %281 = vpush %v255_v16 }
 0x101   :  { %s282_s2 = spop %281 }
 0x102   :  { %v257_v17 = vstv %s282_s2 }
 0x103   :  { %258 = vst [vmem:[%s394_s3] sm:$0xff] %v257_v17 }

</bundles_post_ra>
